<compile_context>
chip_gen: v5e
topology: v5e:2x2
jax: 0.10.0
libtpu: 0.0.40
codegen_flags: <defaults>
</compile_context>

<pallas_src>
import functools

import jax
import jax.numpy as jnp
from jax.experimental import pallas as pl
from jax.experimental.pallas import tpu as pltpu

IN_FEATURES = 784        # 1*28*28 after torch.flatten(x, 1)
OUT_FEATURES = 10
OUT_PAD = 128            # lane-dense padded output width (full, unmasked vst)
MAX_BATCH_TILE = 1024    # review: 512-1024; 1024 fits every generation's scoped VMEM default


def linear_kernel(x_ref, w_ref, b_ref, o_ref):
    # x: (B, 784), w: (784, 128) resident, b: (1, 128) resident -> o: (B, 128)
    o_ref[...] = jnp.dot(x_ref[...], w_ref[...],
                         preferred_element_type=jnp.float32) + b_ref[...]


def _round_up(x, m):
    return ((x + m - 1) // m) * m


def _pick_batch_tile(n):
    """Batch tile: multiple of 8 sublanes, capped, and >= 2 grid steps when possible."""
    if n <= 16:
        return max(8, _round_up(n, 8))
    # Aim for at least 2 grid steps so the "parallel" axis shards across the
    # 2 TensorCores on v7x; cap at MAX_BATCH_TILE for large N.
    return min(MAX_BATCH_TILE, _round_up(pl.cdiv(n, 2), 8))


def prepare_params(w, b):
    """One-time weight/bias re-layout (hoisted out of the per-call hot path).

    (10, 784) -> (784, 10) -> zero-padded to (784, 128); bias -> (1, 128).
    """
    w_t = jnp.pad(w.astype(jnp.float32).T, ((0, 0), (0, OUT_PAD - OUT_FEATURES)))
    b_p = jnp.pad(b.astype(jnp.float32).reshape(1, OUT_FEATURES),
                  ((0, 0), (0, OUT_PAD - OUT_FEATURES)))
    return w_t, b_p


def linear_forward_padded(x, w_t, b_p):
    """x: (N, ...) flattening to 784; w_t: (784, 128); b_p: (1, 128).

    Returns the lane-padded (N, 128) output; valid columns are [:, :10].
    """
    n = x.shape[0]
    xf = x.reshape(n, -1).astype(jnp.float32)          # torch.flatten(x, start_dim=1)
    assert xf.shape[1] == IN_FEATURES, xf.shape

    tile = _pick_batch_tile(n)
    grid = (pl.cdiv(n, tile),)                          # ragged tail: no jnp.pad of x

    return pl.pallas_call(
        linear_kernel,
        out_shape=jax.ShapeDtypeStruct((n, OUT_PAD), jnp.float32),
        grid_spec=pltpu.PrefetchScalarGridSpec(
            num_scalar_prefetch=0,
            grid=grid,
            in_specs=[
                pl.BlockSpec((tile, IN_FEATURES), lambda i: (i, 0)),      # activation tile (streams)
                pl.BlockSpec((IN_FEATURES, OUT_PAD), lambda i: (0, 0)),   # W (VMEM-resident)
                pl.BlockSpec((1, OUT_PAD), lambda i: (0, 0)),             # bias (VMEM-resident)
            ],
            out_specs=pl.BlockSpec((tile, OUT_PAD), lambda i: (i, 0)),
        ),
        compiler_params=pltpu.CompilerParams(
            dimension_semantics=("parallel",)),
    )(xf, w_t, b_p)


def linear_forward(x, w_t, b_p):
    """Module-equivalent forward: (N, ...) -> (N, 10)."""
    return linear_forward_padded(x, w_t, b_p)[:, :OUT_FEATURES]


# ---------------- reference (pure JAX/XLA) for numerical sanity-check ----------------
def reference_forward(x, w, b):
    n = x.shape[0]
    return x.reshape(n, -1).astype(jnp.float32) @ w.T + b


def init_params(key):
    """PyTorch-style nn.Linear(784, 10) init: U(-1/sqrt(fan_in), 1/sqrt(fan_in))."""
    kw, kb = jax.random.split(key)
    bound = 1.0 / (IN_FEATURES ** 0.5)
    w = jax.random.uniform(kw, (OUT_FEATURES, IN_FEATURES), jnp.float32, -bound, bound)
    b = jax.random.uniform(kb, (OUT_FEATURES,), jnp.float32, -bound, bound)
    return w, b


if __name__ == "__main__":
    key = jax.random.PRNGKey(0)
    pkey, xkey, xkey2 = jax.random.split(key, 3)
    w, b = init_params(pkey)
    w_t, b_p = prepare_params(w, b)            # hoisted: done once, not per call

    fwd = jax.jit(linear_forward)

    # Small test (batch=2), consistent with the module's 1x28x28 input.
    x = jax.random.normal(xkey, (2, 1, 28, 28), dtype=jnp.float32)
    out = jax.block_until_ready(fwd(x, w_t, b_p))
    ref = jax.block_until_ready(reference_forward(x, w, b))
    assert out.shape == (2, OUT_FEATURES), out.shape
    err = float(jnp.max(jnp.abs(out - ref)))
    if err > 1e-4:
        raise AssertionError(f"mismatch vs reference (N=2), max abs err = {err}")

    # Ragged multi-step grid test (N=300 -> 2 grid steps, masked tail writeback).
    x2 = jax.random.normal(xkey2, (300, 1, 28, 28), dtype=jnp.float32)
    out2 = jax.block_until_ready(fwd(x2, w_t, b_p))
    ref2 = jax.block_until_ready(reference_forward(x2, w, b))
    assert out2.shape == (300, OUT_FEATURES), out2.shape
    err2 = float(jnp.max(jnp.abs(out2 - ref2)))
    if err2 > 1e-4:
        raise AssertionError(f"mismatch vs reference (N=300), max abs err = {err2}")

    print("KERNEL_OK")
</pallas_src>

<mosaic_0001>
module attributes {stable_mosaic.version = 11 : i64} {
  func.func @linear_kernel(%arg0: i32, %arg1: memref<8x784xf32, #tpu.memory_space<vmem>>, %arg2: memref<784x128xf32, #tpu.memory_space<vmem>>, %arg3: memref<1x128xf32, #tpu.memory_space<vmem>>, %arg4: memref<8x128xf32, #tpu.memory_space<vmem>>) attributes {dimension_semantics = [#tpu.dimension_semantics<parallel>], iteration_bounds = array<i64: 1>, scalar_prefetch = 0 : i64, scratch_operands = 0 : i64, tpu.core_type = #tpu.core_type<tc>, window_params = [{transform_indices = @transform_0, window_bounds = array<i64: 8, 784>}, {pipeline_mode = #tpu.pipeline_mode<synchronous>, transform_indices = @transform_1, window_bounds = array<i64: 784, 128>}, {pipeline_mode = #tpu.pipeline_mode<synchronous>, transform_indices = @transform_2, window_bounds = array<i64: 1, 128>}, {transform_indices = @transform_3, window_bounds = array<i64: 8, 128>}]} {
    %c0 = arith.constant 0 : index
    %c0_0 = arith.constant 0 : index
    %0 = vector.load %arg1[%c0, %c0_0] : memref<8x784xf32, #tpu.memory_space<vmem>>, vector<8x784xf32>
    %c0_1 = arith.constant 0 : index
    %c0_2 = arith.constant 0 : index
    %1 = vector.load %arg2[%c0_1, %c0_2] : memref<784x128xf32, #tpu.memory_space<vmem>>, vector<784x128xf32>
    %cst = arith.constant dense<0.000000e+00> : vector<8x128xf32>
    %2 = tpu.matmul %0, %1, %cst {dimension_numbers = #tpu.dot_dimension_numbers<[1], [0], [0], [1], [0, 0, 1, 1], [], []>} : vector<8x784xf32>, vector<784x128xf32>, vector<8x128xf32> -> vector<8x128xf32>
    %c0_3 = arith.constant 0 : index
    %c0_4 = arith.constant 0 : index
    %3 = vector.load %arg3[%c0_3, %c0_4] : memref<1x128xf32, #tpu.memory_space<vmem>>, vector<1x128xf32>
    %4 = vector.broadcast %3 : vector<1x128xf32> to vector<8x128xf32>
    %5 = arith.addf %2, %4 : vector<8x128xf32>
    %c0_5 = arith.constant 0 : index
    %c0_6 = arith.constant 0 : index
    %6 = vector.load %arg4[%c0_5, %c0_6] : memref<8x128xf32, #tpu.memory_space<vmem>>, vector<8x128xf32>
    tpu.vector_store %arg4[%c0_5, %c0_6], %5 {strides = array<i32>} : memref<8x128xf32, #tpu.memory_space<vmem>>, vector<8x128xf32>,
    return
  }
  func.func @transform_0(%arg0: i32) -> (i32, i32) {
    %c0_i32 = arith.constant 0 : i32
    %c0_i32_0 = arith.constant 0 : i32
    return %arg0, %c0_i32 : i32, i32
  }
  func.func @transform_1(%arg0: i32) -> (i32, i32) {
    %c0_i32 = arith.constant 0 : i32
    %c0_i32_0 = arith.constant 0 : i32
    %c0_i32_1 = arith.constant 0 : i32
    return %c0_i32, %c0_i32_0 : i32, i32
  }
  func.func @transform_2(%arg0: i32) -> (i32, i32) {
    %c0_i32 = arith.constant 0 : i32
    %c0_i32_0 = arith.constant 0 : i32
    %c0_i32_1 = arith.constant 0 : i32
    return %c0_i32, %c0_i32_0 : i32, i32
  }
  func.func @transform_3(%arg0: i32) -> (i32, i32) {
    %c0_i32 = arith.constant 0 : i32
    %c0_i32_0 = arith.constant 0 : i32
    return %arg0, %c0_i32 : i32, i32
  }
}

</mosaic_0001>

<bundles_post_ra>
// kernel: linear_forward.1
= control target key start
LH: loop header
LB: loop body
LE: loop exit
PB: predicated region body
PF: predicated region fallthrough
CT: control target
= control target key end

     0   :  { %8 = vsyncpa [#allocation3], 0  ;;  %s459_s0 = inlined_call_operand.vmem [shape: f32[2,784], index: 0, kind: input, shape index: {}]   ;;  %s460_s1 = inlined_call_operand.hbm [shape: f32[784,128], index: 1, kind: input, shape index: {}]   ;;  %s461_s2 = inlined_call_operand.vmem [shape: f32[1,128], index: 2, kind: input, shape index: {}]   ;;  %s462_s3 = inlined_call_operand.hbm [shape: f32[2,128], index: 3, kind: output, shape index: {}]  }
   0x1   :  { %9 = vsyncpa [#allocation4], 0  ;;  %s16_s14 = sshll.u32 %s460_s1, 4  ;;  %s400_s15 = smov [#allocation2]   ;;  %s17_s14 = int_to_ptr.hbm [resolvable:$true] %s16_s14 }
   0x2   :  { %s18_s16 = sshll.u32 %s400_s15, 4  ;;  %s401_s17 = smov 128   ;;  %s19_s16 = int_to_ptr.vmem [resolvable:$true] %s18_s16 }
   0x3   :  { %s402_s18 = smov 8  }
   0x4   :  { %24 = dma.hbm_to_vmem [thread:$0]  %s17_s14, 12544, %s19_s16, [#allocation3], %s401_s17, %s401_s17, %s402_s18  }
   0x5   :  { %396 = dma.done.wait [#allocation3], 12544  }
   0x6   :  { %397 = vsyncadd [#allocation3], 4294954752  ;;  %v54_v0 = vld [vmem:[#allocation2 + $0x78] sm:$0xff]  ;;  %v53_v1 = vld [vmem:[#allocation2 + $0x70] sm:$0xff]  ;;  %vm177_vm0 = vcmask 130048  }
   0x7   :  { %v70_v2 = vld [vmem:[#allocation2 + $0xf8] sm:$0xff]  ;;  %180 = vmatpush.msra.mxu0 %v54_v0  ;;  %v69_v3 = vld [vmem:[#allocation2 + $0xf0] sm:$0xff]  ;;  %v52_v4 = vld [vmem:[#allocation2 + $0x68] sm:$0xff] }
   0x8   :  { %200 = vmatpush.msra.mxu1 %v70_v2  ;;  %v68_v5 = vld [vmem:[#allocation2 + $0xe8] sm:$0xff]  ;;  %v51_v6 = vld [vmem:[#allocation2 + $0x60] sm:$0xff]  ;;  %v50_v8 = vld [vmem:[#allocation2 + $0x58] sm:$0xff] }
   0x9   :  { %181 = vmatpush.msra.mxu0 %v53_v1  ;;  %v67_v7 = vld [vmem:[#allocation2 + $0xe0] sm:$0xff]  ;;  %v66_v9 = vld [vmem:[#allocation2 + $0xd8] sm:$0xff]  ;;  %v49_v10 = vld [vmem:[#allocation2 + $0x50] sm:$0xff] }
   0xa   :  { %201 = vmatpush.msra.mxu1 %v69_v3  ;;  %v86_v11 = vld [vmem:[#allocation2 + $0x178] sm:$0xff]  ;;  %v65_v12 = vld [vmem:[#allocation2 + $0xd0] sm:$0xff]  ;;  %v84_v15 = vld [vmem:[#allocation2 + $0x168] sm:$0xff] }
   0xb   :  { %182 = vmatpush.msra.mxu0 %v52_v4  ;;  %220 = vmatpush.msra.mxu2 %v86_v11  ;;  %v85_v13 = vld [vmem:[#allocation2 + $0x170] sm:$0xff]  ;;  %v102_v14 = vld [vmem:[#allocation2 + $0x1f8] sm:$0xff]  ;;  %v48_v17 = vld [vmem:[#allocation2 + $0x48] sm:$0xff] }
   0xc   :  { %202 = vmatpush.msra.mxu1 %v68_v5  ;;  %v101_v16 = vld [vmem:[#allocation2 + $0x1f0] sm:$0xff]  ;;  %v64_v18 = vld [vmem:[#allocation2 + $0xc8] sm:$0xff]  ;;  %240 = vmatpush.msra.mxu3 %v102_v14  ;;  %v83_v19 = vld [vmem:[#allocation2 + $0x160] sm:$0xff] }
   0xd   :  { %183 = vmatpush.msra.mxu0 %v51_v6  ;;  %221 = vmatpush.msra.mxu2 %v85_v13  ;;  %v100_v20 = vld [vmem:[#allocation2 + $0x1e8] sm:$0xff]  ;;  %v47_v21 = vld [vmem:[#allocation2 + $0x40] sm:$0xff]  ;;  %v82_v23 = vld [vmem:[#allocation2 + $0x158] sm:$0xff] }
   0xe   :  { %203 = vmatpush.msra.mxu1 %v67_v7  ;;  %v63_v22 = vld [vmem:[#allocation2 + $0xc0] sm:$0xff]  ;;  %241 = vmatpush.msra.mxu3 %v101_v16  ;;  %v46_v25 = vld [vmem:[#allocation2 + $0x38] sm:$0xff]  ;;  %v81_v27 = vld [vmem:[#allocation2 + $0x150] sm:$0xff] }
   0xf   :  { %184 = vmatpush.msra.mxu0 %v50_v8  ;;  %222 = vmatpush.msra.mxu2 %v84_v15  ;;  %v99_v24 = vld [vmem:[#allocation2 + $0x1e0] sm:$0xff]  ;;  %v62_v26 = vld [vmem:[#allocation2 + $0xb8] sm:$0xff]  ;;  %v45_v29 = vld [vmem:[#allocation2 + $0x30] sm:$0xff] }
  0x10   :  { %204 = vmatpush.msra.mxu1 %v66_v9  ;;  %242 = vmatpush.msra.mxu3 %v100_v20  ;;  %v98_v28 = vld [vmem:[#allocation2 + $0x1d8] sm:$0xff]  ;;  %v61_v30 = vld [vmem:[#allocation2 + $0xb0] sm:$0xff]  ;;  %v80_v31 = vld [vmem:[#allocation2 + $0x148] sm:$0xff] }
  0x11   :  { %185 = vmatpush.msra.mxu0 %v49_v10  ;;  %223 = vmatpush.msra.mxu2 %v83_v19  ;;  %v97_v32 = vld [vmem:[#allocation2 + $0x1d0] sm:$0xff]  ;;  %v44_v33 = vld [vmem:[#allocation2 + $0x28] sm:$0xff]  ;;  %v79_v35 = vld [vmem:[#allocation2 + $0x140] sm:$0xff] }
  0x12   :  { %205 = vmatpush.msra.mxu1 %v65_v12  ;;  %243 = vmatpush.msra.mxu3 %v99_v24  ;;  %v60_v34 = vld [vmem:[#allocation2 + $0xa8] sm:$0xff]  ;;  %v43_v37 = vld [vmem:[#allocation2 + $0x20] sm:$0xff]  ;;  %v78_v39 = vld [vmem:[#allocation2 + $0x138] sm:$0xff] }
  0x13   :  { %186 = vmatpush.msra.mxu0 %v48_v17  ;;  %224 = vmatpush.msra.mxu2 %v82_v23  ;;  %v96_v36 = vld [vmem:[#allocation2 + $0x1c8] sm:$0xff]  ;;  %v59_v38 = vld [vmem:[#allocation2 + $0xa0] sm:$0xff]  ;;  %v42_v41 = vld [vmem:[#allocation2 + $0x18] sm:$0xff] }
  0x14   :  { %206 = vmatpush.msra.mxu1 %v64_v18  ;;  %244 = vmatpush.msra.mxu3 %v98_v28  ;;  %v95_v40 = vld [vmem:[#allocation2 + $0x1c0] sm:$0xff]  ;;  %v58_v42 = vld [vmem:[#allocation2 + $0x98] sm:$0xff]  ;;  %v77_v43 = vld [vmem:[#allocation2 + $0x130] sm:$0xff] }
  0x15   :  { %187 = vmatpush.msra.mxu0 %v47_v21  ;;  %225 = vmatpush.msra.mxu2 %v81_v27  ;;  %v94_v44 = vld [vmem:[#allocation2 + $0x1b8] sm:$0xff]  ;;  %v41_v45 = vld [vmem:[#allocation2 + $0x10] sm:$0xff]  ;;  %v76_v47 = vld [vmem:[#allocation2 + $0x128] sm:$0xff] }
  0x16   :  { %207 = vmatpush.msra.mxu1 %v63_v22  ;;  %245 = vmatpush.msra.mxu3 %v97_v32  ;;  %v57_v46 = vld [vmem:[#allocation2 + $0x90] sm:$0xff]  ;;  %v40_v49 = vld [vmem:[#allocation2 + $0x8] sm:$0xff]  ;;  %v39_v50 = vld [vmem:[#allocation2] sm:$0xff] }
  0x17   :  { %188 = vmatpush.msra.mxu0 %v46_v25  ;;  %226 = vmatpush.msra.mxu2 %v80_v31  ;;  %v93_v48 = vld [vmem:[#allocation2 + $0x1b0] sm:$0xff]  ;;  %v56_v51 = vld [vmem:[#allocation2 + $0x88] sm:$0xff]  ;;  %v55_v52 = vld [vmem:[#allocation2 + $0x80] sm:$0xff] }
  0x18   :  { %208 = vmatpush.msra.mxu1 %v62_v26  ;;  %246 = vmatpush.msra.mxu3 %v96_v36  ;;  %v75_v53 = vld [vmem:[#allocation2 + $0x120] sm:$0xff]  ;;  %v92_v54 = vld [vmem:[#allocation2 + $0x1a8] sm:$0xff]  ;;  %v31_v55 = vld [vmem:[%s459_s0] sm:$0xff] }
  0x19   :  { %189 = vmatpush.msra.mxu0 %v45_v29  ;;  %227 = vmatpush.msra.mxu2 %v79_v35  ;;  %v33_v56 = vld [vmem:[%s459_s0 + $0xe] sm:$0xff]  ;;  %v35_v57 = vld [vmem:[%s459_s0 + $0x1c] sm:$0xff]  ;;  %149 = vst [vmem:[#allocation1] ss:$4 sm:$0xff] %v31_v55  ;;  %v32_v5 = vld [vmem:[%s459_s0 + $0x8] sm:$0x3f] }
  0x1a   :  { %209 = vmatpush.msra.mxu1 %v61_v30  ;;  %247 = vmatpush.msra.mxu3 %v95_v40  ;;  %v118_v58 = vld [vmem:[#allocation2 + $0x278] sm:$0xff]  ;;  %v37_v60 = vld [vmem:[%s459_s0 + $0x2a] sm:$0xff]  ;;  %151 = vst [vmem:[#allocation1 + $0x1] ss:$4 sm:$0xff] %v33_v56  ;;  %v117_v63 = vld [vmem:[#allocation2 + $0x270] sm:$0xff] }
  0x1b   :  { %190 = vmatpush.msra.mxu0 %v44_v33  ;;  %228 = vmatpush.msra.mxu2 %v78_v39  ;;  %v134_v59 = vld [vmem:[#allocation2 + $0x2f8] sm:$0xff]  ;;  %v91_v62 = vld [vmem:[#allocation2 + $0x1a0] sm:$0xff]  ;;  %v116_v0 = vld [vmem:[#allocation2 + $0x268] sm:$0xff]  ;;  %153 = vst [vmem:[#allocation1 + $0x2] ss:$4 sm:$0xff] %v35_v57 }
  0x1c   :  { %210 = vmatpush.msra.mxu1 %v60_v34  ;;  %248 = vmatpush.msra.mxu3 %v94_v44  ;;  %v74_v61 = vld [vmem:[#allocation2 + $0x118] sm:$0xff]  ;;  %v133_v1 = vld [vmem:[#allocation2 + $0x2f0] sm:$0xff]  ;;  %v132_v2 = vld [vmem:[#allocation2 + $0x2e8] sm:$0xff]  ;;  %155 = vst [vmem:[#allocation1 + $0x3] ss:$4 sm:$0xff] %v37_v60 }
  0x1d   :  { %191 = vmatpush.msra.mxu0 %v43_v37  ;;  %229 = vmatpush.msra.mxu2 %v77_v43  ;;  %v73_v3 = vld [vmem:[#allocation2 + $0x110] sm:$0xff]  ;;  %v90_v4 = vld [vmem:[#allocation2 + $0x198] sm:$0xff]  ;;  %v72_v8 = vld [vmem:[#allocation2 + $0x108] sm:$0xff]  ;;  %157 = vst [vmem:[#allocation1 + $0x20] ss:$4 sm:$0xff] %v32_v5 }
  0x1e   :  { %211 = vmatpush.msra.mxu1 %v59_v38  ;;  %249 = vmatpush.msra.mxu3 %v93_v48  ;;  %v34_v6 = vld [vmem:[%s459_s0 + $0x16] sm:$0x3f]  ;;  %v36_v7 = vld [vmem:[%s459_s0 + $0x24] sm:$0x3f] }
  0x1f   :  { %192 = vmatpush.msra.mxu0 %v42_v41  ;;  %230 = vmatpush.msra.mxu2 %v76_v47  ;;  %v89_v9 = vld [vmem:[#allocation2 + $0x190] sm:$0xff]  ;;  %v38_v10 = vld [vmem:[%s459_s0 + $0x32] sm:$0x3f]  ;;  %v115_v11 = vld [vmem:[#allocation2 + $0x260] sm:$0xff]  ;;  %159 = vst [vmem:[#allocation1 + $0x21] ss:$4 sm:$0xff] %v34_v6 }
  0x20   :  { %212 = vmatpush.msra.mxu1 %v58_v42  ;;  %250 = vmatpush.msra.mxu3 %v92_v54  ;;  %v131_v12 = vld [vmem:[#allocation2 + $0x2e0] sm:$0xff]  ;;  %v88_v14 = vld [vmem:[#allocation2 + $0x188] sm:$0xff]  ;;  %161 = vst [vmem:[#allocation1 + $0x22] ss:$4 sm:$0xff] %v36_v7  ;;  %v114_v15 = vld [vmem:[#allocation2 + $0x258] sm:$0xff] }
  0x21   :  { %193 = vmatpush.msra.mxu0 %v41_v45  ;;  %231 = vmatpush.msra.mxu2 %v75_v53  ;;  %v71_v13 = vld [vmem:[#allocation2 + $0x100] sm:$0xff]  ;;  %v130_v16 = vld [vmem:[#allocation2 + $0x2d8] sm:$0xff]  ;;  %163 = vst [vmem:[#allocation1 + $0x23] ss:$4 sm:$0xff] %v38_v10  ;;  %v113_v18 = vld [vmem:[#allocation2 + $0x250] sm:$0xff] }
  0x22   :  { %213 = vmatpush.msra.mxu1 %v57_v46  ;;  %251 = vmatpush.msra.mxu3 %v91_v62  ;;  %v87_v17 = vld [vmem:[#allocation2 + $0x180] sm:$0xff]  ;;  %v129_v19 = vld [vmem:[#allocation2 + $0x2d0] sm:$0xff]  ;;  %v136_v21 = vld [vmem:[#allocation2 + $0x308] sm:$0xff] }
  0x23   :  { %194 = vmatpush.msra.mxu0 %v40_v49  ;;  %232 = vmatpush.msra.mxu2 %v74_v61  ;;  %v166_v20 = vld.sshfl [vmem:[#allocation1 + $0x10] sm:$0xff pattern:$0x73625140]  ;;  %v164_v22 = vld.sshfl [vmem:[#allocation1] sm:$0xff pattern:$0x73625140] }
  0x24   :  { %214 = vmatpush.msra.mxu1 %v56_v51  ;;  %252 = vmatpush.msra.mxu3 %v90_v4  ;;  %v112_v23 = vld [vmem:[#allocation2 + $0x248] sm:$0xff]  ;;  %v167_v25 = vld.sshfl [vmem:[#allocation1 + $0x18] sm:$0xff pattern:$0x73625140]  ;;  %v111_v27 = vld [vmem:[#allocation2 + $0x240] sm:$0xff] }
  0x25   :  { %195 = vmatpush.msra.mxu0 %v39_v50  ;;  %233 = vmatpush.msra.mxu2 %v73_v3  ;;  %v128_v24 = vld [vmem:[#allocation2 + $0x2c8] sm:$0xff]  ;;  %v165_v26 = vld.sshfl [vmem:[#allocation1 + $0x8] sm:$0xff pattern:$0x73625140]  ;;  %v110_v30 = vld [vmem:[#allocation2 + $0x238] sm:$0xff] }
  0x26   :  { %215 = vmatpush.msra.mxu1 %v55_v52  ;;  %253 = vmatpush.msra.mxu3 %v89_v9  ;;  %v127_v28 = vld [vmem:[#allocation2 + $0x2c0] sm:$0xff]  ;;  %v126_v31 = vld [vmem:[#allocation2 + $0x2b8] sm:$0xff]  ;;  %v109_v33 = vld [vmem:[#allocation2 + $0x230] sm:$0xff] }
  0x27   :  { %260 = vmatpush.msrb.mxu0 %v118_v58  ;;  %234 = vmatpush.msra.mxu2 %v72_v8  ;;  %v135_v29 = vld [vmem:[#allocation2 + $0x300] sm:$0xff]  ;;  %v125_v34 = vld [vmem:[#allocation2 + $0x2b0] sm:$0xff]  ;;  %v108_v35 = vld [vmem:[#allocation2 + $0x228] sm:$0xff] }
  0x28   :  { %280 = vmatpush.msrb.mxu1 %v134_v59  ;;  %254 = vmatpush.msra.mxu3 %v88_v14  ;;  %v170_v32 = vld.sshfl [vmem:[#allocation1 + $0x30] sm:$0xff pattern:$0x73625140]  ;;  %v107_v37 = vld [vmem:[#allocation2 + $0x220] sm:$0xff]  ;;  %v106_v39 = vld [vmem:[#allocation2 + $0x218] sm:$0xff] }
  0x29   :  { %261 = vmatpush.msrb.mxu0 %v117_v63  ;;  %235 = vmatpush.msra.mxu2 %v71_v13  ;;  %v124_v36 = vld [vmem:[#allocation2 + $0x2a8] sm:$0xff]  ;;  %v123_v38 = vld [vmem:[#allocation2 + $0x2a0] sm:$0xff]  ;;  %v122_v40 = vld [vmem:[#allocation2 + $0x298] sm:$0xff] }
  0x2a   :  { %281 = vmatpush.msrb.mxu1 %v133_v1  ;;  %236 = vmatmul.f32.vlgmr.msra.gmra.mxu2 %v166_v20  ;;  %v105_v41 = vld [vmem:[#allocation2 + $0x210] sm:$0xff]  ;;  %v104_v43 = vld [vmem:[#allocation2 + $0x208] sm:$0xff]  ;;  %v103_v45 = vld [vmem:[#allocation2 + $0x200] sm:$0xff] }
  0x2b   :  { %262 = vmatpush.msrb.mxu0 %v116_v0  ;;  %255 = vmatpush.msra.mxu3 %v87_v17  ;;  %v121_v42 = vld [vmem:[#allocation2 + $0x290] sm:$0xff]  ;;  %v120_v44 = vld [vmem:[#allocation2 + $0x288] sm:$0xff]  ;;  %v119_v46 = vld [vmem:[#allocation2 + $0x280] sm:$0xff] }
  0x2c   :  { %282 = vmatpush.msrb.mxu1 %v132_v2  ;;  %314 = vmatpush.msrb.mxu2 %v136_v21  ;;  %v168_v47 = vld.sshfl [vmem:[#allocation1 + $0x20] sm:$0xff pattern:$0x73625140]  ;;  %v169_v48 = vld.sshfl [vmem:[#allocation1 + $0x28] sm:$0xff pattern:$0x73625140] }
  0x2d   :  { %263 = vmatpush.msrb.mxu0 %v115_v11  ;;  %256 = vmatmul.f32.vlgmr.msra.gmra.mxu3 %v167_v25  ;;  %v347_v49 = vld [vmem:[%s461_s2] ss:$0 sm:$0xff] }
  0x2e   :  { %283 = vmatpush.msrb.mxu1 %v131_v12  ;;  %196 = vmatmul.f32.vlgmr.msra.gmra.mxu0 %v164_v22 }
  0x2f   :  { %264 = vmatpush.msrb.mxu0 %v114_v15  ;;  %216 = vmatmul.f32.vlgmr.msra.gmra.mxu1 %v165_v26 }
  0x30   :  { %284 = vmatpush.msrb.mxu1 %v130_v16  ;;  %315 = vmatpush.msrb.mxu2 %v135_v29 }
  0x31   :  { %265 = vmatpush.msrb.mxu0 %v113_v18 }
  0x32   :  { %285 = vmatpush.msrb.mxu1 %v129_v19  ;;  %340 = vmatmul.msk.f32.vlgmr.msrb.gmra.mxu2 %vm177_vm0, %v170_v32 }
  0x33   :  { %266 = vmatpush.msrb.mxu0 %v112_v23 }
  0x34   :  { %286 = vmatpush.msrb.mxu1 %v128_v24 }
  0x35   :  { %267 = vmatpush.msrb.mxu0 %v111_v27 }
  0x36   :  { %287 = vmatpush.msrb.mxu1 %v127_v28 }
  0x37   :  { %268 = vmatpush.msrb.mxu0 %v110_v30 }
  0x38   :  { %288 = vmatpush.msrb.mxu1 %v126_v31 }
  0x39   :  { %269 = vmatpush.msrb.mxu0 %v109_v33 }
  0x3a   :  { %289 = vmatpush.msrb.mxu1 %v125_v34 }
  0x3b   :  { %270 = vmatpush.msrb.mxu0 %v108_v35 }
  0x3c   :  { %290 = vmatpush.msrb.mxu1 %v124_v36 }
  0x3d   :  { %271 = vmatpush.msrb.mxu0 %v107_v37 }
  0x3e   :  { %291 = vmatpush.msrb.mxu1 %v123_v38 }
  0x3f   :  { %272 = vmatpush.msrb.mxu0 %v106_v39 }
  0x40   :  { %292 = vmatpush.msrb.mxu1 %v122_v40 }
  0x41   :  { %273 = vmatpush.msrb.mxu0 %v105_v41 }
  0x42   :  { %293 = vmatpush.msrb.mxu1 %v121_v42 }
  0x43   :  { %274 = vmatpush.msrb.mxu0 %v104_v43 }
  0x44   :  { %294 = vmatpush.msrb.mxu1 %v120_v44 }
  0x45   :  { %275 = vmatpush.msrb.mxu0 %v103_v45 }
  0x46   :  { %295 = vmatpush.msrb.mxu1 %v119_v46  ;;  %276 = vmatmul.f32.vlgmr.msrb.gmra.mxu0 %v168_v47 }
  0x47   :  { %296 = vmatmul.f32.vlgmr.msrb.gmra.mxu1 %v169_v48 }
  0xab   :  { %v197_v50 = vpop.f32.mrf.mxu0 }
  0xac   :  { %v198_v51 = vadd.f32 %v347_v49, %v197_v50  ;;  %v217_v52 = vpop.f32.mrf.mxu1 }
  0xad   :  { %v237_v54 = vpop.f32.mrf.mxu2 }
  0xae   :  { %v218_v53 = vadd.f32 %v217_v52, %v198_v51 }
  0xb0   :  { %v238_v55 = vadd.f32 %v237_v54, %v218_v53  ;;  %v257_v56 = vpop.f32.mrf.mxu3 }
  0xb2   :  { %v258_v57 = vadd.f32 %v257_v56, %v238_v55 }
  0xb5   :  { %v317_v61 = vpop.f32.mrf.mxu2 }
  0xc3   :  { %v277_v58 = vpop.f32.mrf.mxu0 }
  0xc4   :  { %v297_v59 = vpop.f32.mrf.mxu1  ;;  %v278_v60 = vadd.f32 %v277_v58, %v258_v57 }
  0xc6   :  { %v298_v62 = vadd.f32 %v297_v59, %v278_v60 }
  0xc8   :  { %v318_v63 = vadd.f32 %v317_v61, %v298_v62 }
  0xca   :  { %320 = vst [vmem:[#allocation5] sm:$0xff] %v318_v63 }
  0xcb   :  { %324 = vsyncadd [#allocation4], 96  ;;  %s327_s2 = sshll.u32 %s462_s3, 4  ;;  %s403_s10 = smov [#allocation5]   ;;  %s328_s2 = int_to_ptr.hbm [resolvable:$true] %s327_s2 }
  0xcc   :  { %s325_s11 = sshll.u32 %s403_s10, 4  ;;  %s404_s12 = smov 32   ;;  %s326_s11 = int_to_ptr.vmem [resolvable:$true] %s325_s11 }
  0xcd   :  { %s405_s13 = smov 2  }
  0xce   :  { %333 = dma.vmem_to_hbm [thread:$0]  %s326_s11, 32, %s328_s2, [#allocation4], %s404_s12, %s404_s12, %s405_s13  }
  0xcf   :  { %398 = dma.done.wait [#allocation4], 128  }
  0xd0   :  { %399 = vsyncadd [#allocation4], 4294967168 }
  0xd1   :  { %338 = vsyncpa [#allocation3], 1 }
  0xd2   :  { %339 = vsyncpa [#allocation4], 1 }

</bundles_post_ra>
